<compile_context>
chip_gen: v5e
topology: v5e:2x2
jax: 0.10.0
libtpu: 0.0.40
codegen_flags: <defaults>
</compile_context>

<pallas_src>
import jax
import jax.numpy as jnp
from jax.experimental import pallas as pl
from jax.experimental.pallas import tpu as pltpu

LANES = 128  # TPU lane width


def _round_up(n, m):
    return (n + m - 1) // m * m


def dqn_kernel(x_ref, w1_ref, b1_ref, w2_ref, b2_ref, o_ref):
    # Layer 1: Linear(n_inputs -> 128) + ReLU.  bf16 into the MXU, f32 accum.
    x_bf = x_ref[...].astype(jnp.bfloat16)
    h = jnp.dot(x_bf, w1_ref[...], preferred_element_type=jnp.float32)
    h = jnp.maximum(h + b1_ref[...], 0.0)        # bias + ReLU stay in f32 (v5e VPU)
    # Layer 2: Linear(128 -> n_actions), output lanes pre-padded to 128.
    out = jnp.dot(h.astype(jnp.bfloat16), w2_ref[...],
                  preferred_element_type=jnp.float32)
    o_ref[...] = (out + b2_ref[...]).astype(o_ref.dtype)


def dqn_forward(x, w1, b1, w2, b2, *, tile_b=512):
    B, n_in = x.shape
    hidden, n_actions = w2.shape

    # Row tile: multiple of 8 sublanes, capped at tile_b; pad batch to a whole
    # number of tiles (guards the ragged last tile).
    tile_b = min(tile_b, _round_up(B, 8))
    B_pad = _round_up(B, tile_b)
    if B_pad != B:
        x = jnp.pad(x, ((0, B_pad - B), (0, 0)))

    # Lane-dense output: pad layer-2 weights/bias to 128 output columns.
    n_out_pad = _round_up(n_actions, LANES)
    w2p = jnp.pad(w2, ((0, 0), (0, n_out_pad - n_actions)))
    b2p = jnp.pad(b2, ((0, 0), (0, n_out_pad - n_actions)))

    # Weights at rest in bf16 (halves resident footprint, bf16-native MXU on
    # v6e/v7x); biases stay f32 for the f32 elementwise path.
    w1_bf = w1.astype(jnp.bfloat16)
    w2_bf = w2p.astype(jnp.bfloat16)

    grid = (B_pad // tile_b,)

    def _nbytes(a):
        return a.size * a.dtype.itemsize

    cost = pl.CostEstimate(
        flops=2 * B_pad * (n_in * hidden + hidden * n_out_pad),
        transcendentals=0,
        bytes_accessed=(_nbytes(x) + _nbytes(w1_bf) + _nbytes(b1)
                        + _nbytes(w2_bf) + _nbytes(b2p)
                        + B_pad * n_out_pad * 4),
    )

    out_padded = pl.pallas_call(
        dqn_kernel,
        out_shape=jax.ShapeDtypeStruct((B_pad, n_out_pad), jnp.float32),
        grid=grid,
        in_specs=[
            pl.BlockSpec((tile_b, n_in), lambda i: (i, 0)),        # x tile
            pl.BlockSpec(w1_bf.shape, lambda i: (0, 0)),           # resident
            pl.BlockSpec(b1.shape, lambda i: (0, 0)),              # resident
            pl.BlockSpec(w2_bf.shape, lambda i: (0, 0)),           # resident
            pl.BlockSpec(b2p.shape, lambda i: (0, 0)),             # resident
        ],
        out_specs=pl.BlockSpec((tile_b, n_out_pad), lambda i: (i, 0)),
        compiler_params=pltpu.CompilerParams(
            dimension_semantics=("parallel",)),
        cost_estimate=cost,
    )(x, w1_bf, b1, w2_bf, b2p)

    return out_padded[:B, :n_actions]


def init_params(key, n_inputs, n_actions, hidden=128):
    # Deterministic init mimicking PyTorch's default Linear init:
    # U(-1/sqrt(fan_in), 1/sqrt(fan_in)) for both weights and biases.
    k1, k2, k3, k4 = jax.random.split(key, 4)
    bound1 = 1.0 / jnp.sqrt(jnp.float32(n_inputs))
    bound2 = 1.0 / jnp.sqrt(jnp.float32(hidden))
    w1 = jax.random.uniform(k1, (n_inputs, hidden), jnp.float32, -bound1, bound1)
    b1 = jax.random.uniform(k2, (1, hidden), jnp.float32, -bound1, bound1)
    w2 = jax.random.uniform(k3, (hidden, n_actions), jnp.float32, -bound2, bound2)
    b2 = jax.random.uniform(k4, (1, n_actions), jnp.float32, -bound2, bound2)
    return w1, b1, w2, b2


def _reference_bf16(x, w1, b1, w2, b2):
    # Pure-JAX reference mimicking the kernel's bf16-matmul / f32-accum path.
    h = jnp.dot(x.astype(jnp.bfloat16), w1.astype(jnp.bfloat16),
                preferred_element_type=jnp.float32) + b1
    h = jnp.maximum(h, 0.0)
    return jnp.dot(h.astype(jnp.bfloat16), w2.astype(jnp.bfloat16),
                   preferred_element_type=jnp.float32) + b2


if __name__ == "__main__":
    # CartPole-v1: observation dim = 4, actions = 2.
    n_inputs, n_actions = 4, 2

    key = jax.random.PRNGKey(0)
    kx, kx2, kp = jax.random.split(key, 3)
    w1, b1, w2, b2 = init_params(kp, n_inputs, n_actions)

    # Small batch (single tile, single grid step).
    batch = 8
    x = jax.random.normal(kx, (batch, n_inputs), jnp.float32)
    out = dqn_forward(x, w1, b1, w2, b2)
    jax.block_until_ready(out)
    assert out.shape == (batch, n_actions)
    ref = _reference_bf16(x, w1, b1, w2, b2)
    assert jnp.allclose(out, ref, atol=2e-3), "mismatch vs bf16 reference"
    ref_f32 = jnp.maximum(x @ w1 + b1, 0.0) @ w2 + b2
    assert jnp.allclose(out, ref_f32, atol=5e-2), "mismatch vs f32 reference"

    # Larger ragged batch: exercises the multi-step batch grid + zero padding.
    batch2 = 1000
    x2 = jax.random.normal(kx2, (batch2, n_inputs), jnp.float32)
    out2 = dqn_forward(x2, w1, b1, w2, b2)
    jax.block_until_ready(out2)
    assert out2.shape == (batch2, n_actions)
    ref2 = _reference_bf16(x2, w1, b1, w2, b2)
    assert jnp.allclose(out2, ref2, atol=2e-3), "mismatch vs bf16 reference (batched)"

    print("KERNEL_OK")
</pallas_src>

<mosaic_0001>
module attributes {stable_mosaic.version = 11 : i64} {
  func.func @dqn_kernel(%arg0: i32, %arg1: memref<8x4xf32, #tpu.memory_space<vmem>>, %arg2: memref<4x128xbf16, #tpu.memory_space<vmem>>, %arg3: memref<1x128xf32, #tpu.memory_space<vmem>>, %arg4: memref<128x128xbf16, #tpu.memory_space<vmem>>, %arg5: memref<1x128xf32, #tpu.memory_space<vmem>>, %arg6: memref<8x128xf32, #tpu.memory_space<vmem>>) attributes {dimension_semantics = [#tpu.dimension_semantics<parallel>], iteration_bounds = array<i64: 1>, scalar_prefetch = 0 : i64, scratch_operands = 0 : i64, tpu.core_type = #tpu.core_type<tc>, window_params = [{transform_indices = @transform_0, window_bounds = array<i64: 8, 4>}, {pipeline_mode = #tpu.pipeline_mode<synchronous>, transform_indices = @transform_1, window_bounds = array<i64: 4, 128>}, {pipeline_mode = #tpu.pipeline_mode<synchronous>, transform_indices = @transform_2, window_bounds = array<i64: 1, 128>}, {pipeline_mode = #tpu.pipeline_mode<synchronous>, transform_indices = @transform_3, window_bounds = array<i64: 128, 128>}, {pipeline_mode = #tpu.pipeline_mode<synchronous>, transform_indices = @transform_4, window_bounds = array<i64: 1, 128>}, {transform_indices = @transform_5, window_bounds = array<i64: 8, 128>}]} {
    %c0 = arith.constant 0 : index
    %c0_0 = arith.constant 0 : index
    %0 = vector.load %arg1[%c0, %c0_0] : memref<8x4xf32, #tpu.memory_space<vmem>>, vector<8x4xf32>
    %1 = arith.truncf %0 : vector<8x4xf32> to vector<8x4xbf16>
    %c0_1 = arith.constant 0 : index
    %c0_2 = arith.constant 0 : index
    %2 = vector.load %arg2[%c0_1, %c0_2] : memref<4x128xbf16, #tpu.memory_space<vmem>>, vector<4x128xbf16>
    %cst = arith.constant dense<0.000000e+00> : vector<8x128xf32>
    %3 = tpu.matmul %1, %2, %cst {dimension_numbers = #tpu.dot_dimension_numbers<[1], [0], [0], [1], [0, 0, 1, 1], [], []>} : vector<8x4xbf16>, vector<4x128xbf16>, vector<8x128xf32> -> vector<8x128xf32>
    %c0_3 = arith.constant 0 : index
    %c0_4 = arith.constant 0 : index
    %4 = vector.load %arg3[%c0_3, %c0_4] : memref<1x128xf32, #tpu.memory_space<vmem>>, vector<1x128xf32>
    %5 = vector.broadcast %4 : vector<1x128xf32> to vector<8x128xf32>
    %6 = arith.addf %3, %5 : vector<8x128xf32>
    %cst_5 = arith.constant 0.000000e+00 : f32
    %7 = vector.broadcast %cst_5 : f32 to vector<8x128xf32>
    %8 = arith.maximumf %6, %7 : vector<8x128xf32>
    %9 = arith.truncf %8 : vector<8x128xf32> to vector<8x128xbf16>
    %c0_6 = arith.constant 0 : index
    %c0_7 = arith.constant 0 : index
    %10 = vector.load %arg4[%c0_6, %c0_7] : memref<128x128xbf16, #tpu.memory_space<vmem>>, vector<128x128xbf16>
    %cst_8 = arith.constant dense<0.000000e+00> : vector<8x128xf32>
    %11 = tpu.matmul %9, %10, %cst_8 {dimension_numbers = #tpu.dot_dimension_numbers<[1], [0], [0], [1], [0, 0, 1, 1], [], []>} : vector<8x128xbf16>, vector<128x128xbf16>, vector<8x128xf32> -> vector<8x128xf32>
    %c0_9 = arith.constant 0 : index
    %c0_10 = arith.constant 0 : index
    %12 = vector.load %arg5[%c0_9, %c0_10] : memref<1x128xf32, #tpu.memory_space<vmem>>, vector<1x128xf32>
    %13 = vector.broadcast %12 : vector<1x128xf32> to vector<8x128xf32>
    %14 = arith.addf %11, %13 : vector<8x128xf32>
    %c0_11 = arith.constant 0 : index
    %c0_12 = arith.constant 0 : index
    %15 = vector.load %arg6[%c0_11, %c0_12] : memref<8x128xf32, #tpu.memory_space<vmem>>, vector<8x128xf32>
    tpu.vector_store %arg6[%c0_11, %c0_12], %14 {strides = array<i32>} : memref<8x128xf32, #tpu.memory_space<vmem>>, vector<8x128xf32>,
    return
  }
  func.func @transform_0(%arg0: i32) -> (i32, i32) {
    %c0_i32 = arith.constant 0 : i32
    %c0_i32_0 = arith.constant 0 : i32
    return %arg0, %c0_i32 : i32, i32
  }
  func.func @transform_1(%arg0: i32) -> (i32, i32) {
    %c0_i32 = arith.constant 0 : i32
    %c0_i32_0 = arith.constant 0 : i32
    %c0_i32_1 = arith.constant 0 : i32
    return %c0_i32, %c0_i32_0 : i32, i32
  }
  func.func @transform_2(%arg0: i32) -> (i32, i32) {
    %c0_i32 = arith.constant 0 : i32
    %c0_i32_0 = arith.constant 0 : i32
    %c0_i32_1 = arith.constant 0 : i32
    return %c0_i32, %c0_i32_0 : i32, i32
  }
  func.func @transform_3(%arg0: i32) -> (i32, i32) {
    %c0_i32 = arith.constant 0 : i32
    %c0_i32_0 = arith.constant 0 : i32
    %c0_i32_1 = arith.constant 0 : i32
    return %c0_i32, %c0_i32_0 : i32, i32
  }
  func.func @transform_4(%arg0: i32) -> (i32, i32) {
    %c0_i32 = arith.constant 0 : i32
    %c0_i32_0 = arith.constant 0 : i32
    %c0_i32_1 = arith.constant 0 : i32
    return %c0_i32, %c0_i32_0 : i32, i32
  }
  func.func @transform_5(%arg0: i32) -> (i32, i32) {
    %c0_i32 = arith.constant 0 : i32
    %c0_i32_0 = arith.constant 0 : i32
    return %arg0, %c0_i32 : i32, i32
  }
}

</mosaic_0001>

<bundles_post_ra>
// kernel: tpu_custom_call.1
= control target key start
LH: loop header
LB: loop body
LE: loop exit
PB: predicated region body
PF: predicated region fallthrough
CT: control target
= control target key end

     0   :  { %10 = vsyncpa [#allocation3], 0  ;;  %s318_s0 = inlined_call_operand.vmem [shape: f32[8,4], index: 0, kind: input, shape index: {}]   ;;  %s319_s1 = inlined_call_operand.vmem [shape: bf16[4,128], index: 1, kind: input, shape index: {}]   ;;  %s320_s2 = inlined_call_operand.vmem [shape: f32[1,128], index: 2, kind: input, shape index: {}]   ;;  %s321_s3 = inlined_call_operand.hbm [shape: bf16[128,128], index: 3, kind: input, shape index: {}]   ;;  %s322_s4 = inlined_call_operand.vmem [shape: f32[1,128], index: 4, kind: input, shape index: {}]   ;;  %s323_s5 = inlined_call_operand.hbm [shape: f32[8,128], index: 5, kind: output, shape index: {}]  }
   0x1   :  { %11 = vsyncpa [#allocation4], 0  ;;  %s22_s20 = sshll.u32 %s321_s3, 4  ;;  %s266_s21 = smov [#allocation2]   ;;  %s23_s20 = int_to_ptr.hbm [resolvable:$true] %s22_s20 }
   0x2   :  { %s24_s22 = sshll.u32 %s266_s21, 4  ;;  %s267_s23 = smov 64   ;;  %s25_s22 = int_to_ptr.vmem [resolvable:$true] %s24_s22 }
   0x3   :  { %s268_s24 = smov 4  }
   0x4   :  { %30 = dma.hbm_to_vmem [thread:$0]  %s23_s20, 1024, %s25_s22, [#allocation3], %s267_s23, %s267_s23, %s268_s24  }
   0x5   :  { %262 = dma.done.wait [#allocation3], 1024  }
   0x6   :  { %263 = vsyncadd [#allocation3], 4294966272  ;;  %vm49_vm0 = vcmask 1041408   ;;  %v40_v0 = vld [vmem:[%s319_s1] sm:$0x3]  ;;  %v207_v2 = vld [vmem:[#allocation2 + $0x38] sm:$0xff] }
   0x7   :  { %v38_v1 = vld [vmem:[%s318_s0] sm:$0xff]  ;;  %v51_v3 = vsel %vm49_vm0, %v40_v0, 0  ;;  %vm45_vm1 = vcmask 31744   ;;  %136 = vmatpush.bf16.msra.mxu1 %v207_v2  ;;  %v206_v5 = vld [vmem:[#allocation2 + $0x30] sm:$0xff]  ;;  %v205_v6 = vld [vmem:[#allocation2 + $0x28] sm:$0xff]  ;;  %s269_s30 = smov [#allocation5]  }
   0x8   :  { %v39_v4 = vpack.c.bf16 %v38_v1, %v38_v1  ;;  %60 = vmatpush.bf16.msra.mxu0 %v51_v3  ;;  %v204_v7 = vld [vmem:[#allocation2 + $0x20] sm:$0xff]  ;;  %v203_v8 = vld [vmem:[#allocation2 + $0x18] sm:$0xff]  ;;  %v202_v9 = vld [vmem:[#allocation2 + $0x10] sm:$0xff]  ;;  %s155_s6 = sshll.u32 %s269_s30, 4  ;;  %s157_s9 = sshll.u32 %s323_s5, 4  ;;  %s156_s6 = int_to_ptr.vmem [resolvable:$true] %s155_s6  ;;  %s158_s9 = int_to_ptr.hbm [resolvable:$true] %s157_s9 }
   0x9   :  { %v201_v10 = vld [vmem:[#allocation2 + $0x8] sm:$0xff]  ;;  %v200_v11 = vld [vmem:[#allocation2] sm:$0xff] }
   0xa   :  { %v212_v12 = vld [vmem:[%s320_s2] ss:$0 sm:$0xff] }
   0xb   :  { %167 = vmatmul.msk.bf16.vlgmr.msra.gmra.mxu0 %vm45_vm1, %v39_v4  ;;  %137 = vmatpush.bf16.msra.mxu1 %v206_v5  ;;  %v213_v18 = vld [vmem:[%s322_s4] ss:$0 sm:$0xff] }
   0xf   :  { %138 = vmatpush.bf16.msra.mxu1 %v205_v6 }
  0x13   :  { %139 = vmatpush.bf16.msra.mxu1 %v204_v7 }
  0x17   :  { %140 = vmatpush.bf16.msra.mxu1 %v203_v8 }
  0x1b   :  { %141 = vmatpush.bf16.msra.mxu1 %v202_v9 }
  0x1f   :  { %142 = vmatpush.bf16.msra.mxu1 %v201_v10 }
  0x23   :  { %143 = vmatpush.bf16.msra.mxu1 %v200_v11 }
  0x88   :  { %v62_v13 = vpop.f32.mrf.mxu0 }
  0x89   :  { %v63_v14 = vadd.f32 %v212_v12, %v62_v13 }
  0x8b   :  { %v66_v15 = vmax.f32 %v63_v14, 0.0 }
  0x8d   :  { %v67_v16 = vpack.c.bf16 %v66_v15, %v66_v15 }
  0x8f   :  { %144 = vmatmul.bf16.vlgmr.msra.gmra.mxu1 %v67_v16 }
  0x90   :  { %v64_v17 = vpop.f32.mrf.mxu0 }
 0x10c   :  { %v145_v19 = vpop.f32.mrf.mxu1 }
 0x10d   :  { %v146_v20 = vadd.f32 %v213_v18, %v145_v19 }
 0x10f   :  { %149 = vst [vmem:[#allocation5] sm:$0xff] %v146_v20 }
 0x110   :  { %160 = dma.vmem_to_hbm [thread:$0]  %s156_s6, 128, %s158_s9, [#allocation4]  }
 0x114   :  { %v147_v21 = vpop.f32.mrf.mxu1 }
 0x115   :  { %264 = dma.done.wait [#allocation4], 128  }
 0x116   :  { %265 = vsyncadd [#allocation4], 4294967168 }
 0x117   :  { %165 = vsyncpa [#allocation3], 1 }
 0x118   :  { %166 = vsyncpa [#allocation4], 1 }

</bundles_post_ra>
